<compile_context>
chip_gen: v6e
topology: v6e:2x2x1
jax: 0.10.0
libtpu: 0.0.40
codegen_flags: <defaults>
</compile_context>

<pallas_src>
import jax
import jax.numpy as jnp
from jax.experimental import pallas as pl
from jax.experimental.pallas import tpu as pltpu

LANE = 128  # TPU lane width; feature dims are padded to a multiple of this.


def _round_up(x, m):
    return (x + m - 1) // m * m


# ----------------------------------------------------------------------------- kernel
def _gru_decoder_kernel(cap_ref, emb_ref, h0_ref, w_ref, b_ref,
                        wout_ref, bout_ref, logits_ref, h_ref):
    """Runs all T decode timesteps in one kernel invocation.

    cap_ref:    (T*B,)        int32 SMEM  scalar-prefetched token ids (t-major)
    emb_ref:    (V, Hp)       bf16  VMEM  embedding table (lane-padded)
    h0_ref:     (L, B, Hp)    f32         initial hidden state (lane-padded)
    w_ref:      (L, 2Hp, 4Hp) bf16        fused GRU weights, rows [x | h],
                                          cols [r | z | n_x | n_h]
    b_ref:      (L, 1, 4Hp)   f32         fused GRU bias [b_ir+b_hr | b_iz+b_hz | b_in | b_hn]
    wout_ref:   (Hp, Op)      bf16        W_out^T
    bout_ref:   (1, Op)       f32
    logits_ref: (T, B, Op)    f32         per-step logits (resident, lane-dense)
    h_ref:      (L, B, Hp)    f32         hidden-state carry / final hidden output
    """
    T, B, Op = logits_ref.shape
    L, _, Hp = h_ref.shape
    V = emb_ref.shape[0]

    # Seed the resident hidden-state carry.
    h_ref[...] = h0_ref[...]

    # Loop-invariant values hoisted out of the timestep loop
    # (JAX does not CSE broadcasts/iotas inside loops).
    emb = emb_ref[...]                                   # (V, Hp)   bf16 (~10 KiB)
    wout = wout_ref[...]                                 # (Hp, Op)  bf16
    bout = bout_ref[...]                                 # (1, Op)   f32
    row_iota = jax.lax.broadcasted_iota(jnp.int32, (B, V), 0)
    col_iota = jax.lax.broadcasted_iota(jnp.int32, (B, V), 1)

    @pl.loop(0, T)
    def _step(t):
        # ---- embedding lookup as a one-hot matmul on the MXU ------------------
        # Out-of-range token ids produce an all-zero one-hot row (no OOB read).
        onehot = jnp.zeros((B, V), jnp.float32)
        for b in range(B):                               # B small & static -> unrolled
            tok = cap_ref[t * B + b]                     # scalar read from SMEM
            onehot = onehot + jnp.where(
                (row_iota == b) & (col_iota == tok), 1.0, 0.0)
        x = jnp.dot(onehot.astype(emb.dtype), emb,
                    preferred_element_type=jnp.float32)  # (B, Hp) f32

        # ---- stacked GRU cells (num_layers static -> unrolled) ----------------
        for l in range(L):
            h = h_ref[l]                                                 # (B, Hp) f32
            xh = jnp.concatenate([x, h], axis=-1).astype(w_ref.dtype)    # (B, 2Hp) bf16
            # One fused MXU matmul per layer; f32 accumulation, f32 gate math.
            g = jnp.dot(xh, w_ref[l], preferred_element_type=jnp.float32) + b_ref[l]
            # Gate column groups sit on 128-lane boundaries (Hp multiple of 128).
            r = jax.nn.sigmoid(g[:, 0:Hp])
            z = jax.nn.sigmoid(g[:, Hp:2 * Hp])
            n = jnp.tanh(g[:, 2 * Hp:3 * Hp] + r * g[:, 3 * Hp:4 * Hp])
            h_new = (1.0 - z) * n + z * h
            h_ref[l] = h_new                             # in-place carry
            x = h_new                                    # feeds next layer

        logits = jnp.dot(x.astype(wout.dtype), wout,
                         preferred_element_type=jnp.float32) + bout      # (B, Op)
        logits_ref[pl.ds(t, 1), :, :] = logits[None].astype(logits_ref.dtype)


# ----------------------------------------------------------------------------- wrapper
def _decode_steps(captions_tb, hidden_padded, kp):
    """Run T fused decode steps. captions_tb: (T, B) int32; hidden_padded: (L, B, Hp)."""
    T, B = captions_tb.shape
    L, _, Hp = hidden_padded.shape
    V = kp["embedding"].shape[0]
    Op = kp["out_w_t"].shape[1]

    caps_flat = captions_tb.reshape(T * B).astype(jnp.int32)   # 1-D SMEM (tiny pad)

    c2 = lambda i, cap: (0, 0)        # every block is the whole (resident) array
    c3 = lambda i, cap: (0, 0, 0)

    grid_spec = pltpu.PrefetchScalarGridSpec(
        num_scalar_prefetch=1,                     # captions -> SMEM
        grid=(1,),                                 # T loop runs inside the kernel
        in_specs=[
            pl.BlockSpec((V, Hp), c2),             # embedding table
            pl.BlockSpec((L, B, Hp), c3),          # h0
            pl.BlockSpec((L, 2 * Hp, 4 * Hp), c3), # fused GRU weights
            pl.BlockSpec((L, 1, 4 * Hp), c3),      # fused GRU bias
            pl.BlockSpec((Hp, Op), c2),            # W_out^T
            pl.BlockSpec((1, Op), c2),             # b_out
        ],
        out_specs=(
            pl.BlockSpec((T, B, Op), c3),          # logits for all T steps (one writeback)
            pl.BlockSpec((L, B, Hp), c3),          # final hidden
        ),
    )
    # NOTE: with grid=(1,) each block is fetched exactly once, so multi-buffering
    # (pipeline_mode) is irrelevant; resident footprint here is ~1 MiB (bf16).

    wbytes = sum(int(v.size) * v.dtype.itemsize
                 for v in (kp["embedding"], kp["w_fused"], kp["b_fused"],
                           kp["out_w_t"], kp["out_b"]))
    flops = T * (2 * B * V * Hp                       # one-hot gather
                 + L * 2 * B * (2 * Hp) * (4 * Hp)    # fused GRU matmuls
                 + 2 * B * Hp * Op)                   # output projection
    cost = pl.CostEstimate(
        flops=flops,
        transcendentals=T * L * 3 * B * Hp,
        bytes_accessed=wbytes + 4 * (2 * L * B * Hp + T * B * Op + T * B),
    )

    logits_p, h_p = pl.pallas_call(
        _gru_decoder_kernel,
        grid_spec=grid_spec,
        out_shape=(
            jax.ShapeDtypeStruct((T, B, Op), jnp.float32),
            jax.ShapeDtypeStruct((L, B, Hp), jnp.float32),
        ),
        compiler_params=pltpu.CompilerParams(
            dimension_semantics=("arbitrary",),
            vmem_limit_bytes=32 * 1024 * 1024,
        ),
        cost_estimate=cost,
    )(caps_flat, kp["embedding"], hidden_padded,
      kp["w_fused"], kp["b_fused"], kp["out_w_t"], kp["out_b"])
    return logits_p, h_p


def vanilla_decoder_forward(caption, hidden, encoder_outputs, kparams, output_size):
    """Mirrors VanillaDecoderRNN.forward(caption, hidden, encoder_outputs) (one step)."""
    del encoder_outputs                 # unused by the PyTorch forward
    L, B, H = hidden.shape
    Hp = kparams["embedding"].shape[1]
    h_pad = jnp.pad(hidden.astype(jnp.float32), ((0, 0), (0, 0), (0, Hp - H)))
    caps = caption.astype(jnp.int32).reshape(1, B)
    logits_p, h_p = _decode_steps(caps, h_pad, kparams)
    return logits_p[0, :, :output_size], h_p[:, :, :H]


def vanilla_decoder_run(captions_bt, hidden, kparams, output_size):
    """Teacher-forced multi-step decode fused into one pallas_call.
    captions_bt: (B, T) int32 -> (logits (B, T, output_size), final hidden (L, B, H))."""
    L, B, H = hidden.shape
    Hp = kparams["embedding"].shape[1]
    h_pad = jnp.pad(hidden.astype(jnp.float32), ((0, 0), (0, 0), (0, Hp - H)))
    caps = jnp.transpose(captions_bt.astype(jnp.int32), (1, 0))   # (T, B)
    logits_p, h_p = _decode_steps(caps, h_pad, kparams)
    return jnp.transpose(logits_p[:, :, :output_size], (1, 0, 2)), h_p[:, :, :H]


# ----------------------------------------------------------------------------- params
def init_params(key, hidden_size, output_size, num_layers=2):
    """Synthetic params in PyTorch layout (W_ih/W_hh = (3H, in), gate order r,z,n)."""
    k = 1.0 / float(hidden_size) ** 0.5
    keys = jax.random.split(key, 7)

    def u(kk, shape):
        return jax.random.uniform(kk, shape, jnp.float32, -k, k)

    return dict(
        embedding=jax.random.normal(keys[0], (output_size, hidden_size), jnp.float32),
        w_ih=u(keys[1], (num_layers, 3 * hidden_size, hidden_size)),
        w_hh=u(keys[2], (num_layers, 3 * hidden_size, hidden_size)),
        b_ih=u(keys[3], (num_layers, 1, 3 * hidden_size)),
        b_hh=u(keys[4], (num_layers, 1, 3 * hidden_size)),
        out_w=u(keys[5], (output_size, hidden_size)),
        out_b=u(keys[6], (1, output_size)),
    )


def prepare_params(params, compute_dtype=jnp.bfloat16):
    """One-time repack:
      * transpose to (in, out), zero-pad each gate block to 128 lanes,
      * fuse W_ih / W_hh into one (2Hp, 4Hp) matrix per layer with rows [x | h]
        and column groups [r | z | n_x | n_h] (r/z partial sums accumulate inside
        the MXU; n keeps x- and h-contributions separate so r * gh_n is preserved),
      * cast matmul weights / embedding to `compute_dtype` (bf16 by default);
        biases stay f32 and are added after f32 accumulation."""
    L, threeH, H = params["w_ih"].shape
    O = params["out_w"].shape[0]
    Hp = _round_up(H, LANE)
    Op = _round_up(O, LANE)

    def split_gates_t(w):                    # (L, 3H, H) -> 3 x (L, H_in, H_out)
        w = w.reshape(L, 3, H, H)            # (L, gate, out, in)
        w = jnp.transpose(w, (0, 1, 3, 2))   # (L, gate, in, out)
        return w[:, 0], w[:, 1], w[:, 2]

    wi_r, wi_z, wi_n = split_gates_t(params["w_ih"])
    wh_r, wh_z, wh_n = split_gates_t(params["w_hh"])

    def pad_io(w):                           # (L, H, H) -> (L, Hp, Hp)
        return jnp.pad(w, ((0, 0), (0, Hp - H), (0, Hp - H)))

    zeros = jnp.zeros((L, Hp, Hp), jnp.float32)
    x_rows = jnp.concatenate([pad_io(wi_r), pad_io(wi_z), pad_io(wi_n), zeros], axis=2)
    h_rows = jnp.concatenate([pad_io(wh_r), pad_io(wh_z), zeros, pad_io(wh_n)], axis=2)
    w_fused = jnp.concatenate([x_rows, h_rows], axis=1)            # (L, 2Hp, 4Hp)

    bi = params["b_ih"].reshape(L, 3, H)
    bh = params["b_hh"].reshape(L, 3, H)

    def padb(b):                             # (L, H) -> (L, 1, Hp)
        return jnp.pad(b, ((0, 0), (0, Hp - H))).reshape(L, 1, Hp)

    b_fused = jnp.concatenate(
        [padb(bi[:, 0] + bh[:, 0]), padb(bi[:, 1] + bh[:, 1]),
         padb(bi[:, 2]), padb(bh[:, 2])], axis=2)                  # (L, 1, 4Hp)

    return dict(
        embedding=jnp.pad(params["embedding"], ((0, 0), (0, Hp - H))).astype(compute_dtype),
        w_fused=w_fused.astype(compute_dtype),
        b_fused=b_fused.astype(jnp.float32),
        out_w_t=jnp.pad(params["out_w"].T, ((0, Hp - H), (0, Op - O))).astype(compute_dtype),
        out_b=jnp.pad(params["out_b"], ((0, 0), (0, Op - O))).astype(jnp.float32),
    )


# ----------------------------------------------------------------------------- reference
def reference_forward(caption, hidden, params, compute_dtype=jnp.float32):
    """Pure-JAX reference with PyTorch GRU semantics (gate order r, z, n).
    `compute_dtype` quantizes matmul operands (weights + activations) the same
    way the kernel does, while keeping accumulation and gate math in f32."""
    def qd(a):
        return a.astype(compute_dtype).astype(jnp.float32)

    x = qd(params["embedding"])[caption]
    H = x.shape[1]
    new_h = []
    for l in range(hidden.shape[0]):
        h = hidden[l]
        gi = qd(x) @ qd(params["w_ih"][l].T) + params["b_ih"][l]
        gh = qd(h) @ qd(params["w_hh"][l].T) + params["b_hh"][l]
        r = jax.nn.sigmoid(gi[:, :H] + gh[:, :H])
        z = jax.nn.sigmoid(gi[:, H:2 * H] + gh[:, H:2 * H])
        n = jnp.tanh(gi[:, 2 * H:] + r * gh[:, 2 * H:])
        hn = (1.0 - z) * n + z * h
        new_h.append(hn)
        x = hn
    logits = qd(x) @ qd(params["out_w"].T) + params["out_b"]
    return logits, jnp.stack(new_h)


# ----------------------------------------------------------------------------- main
if __name__ == "__main__":
    B, H, O, L, S, T = 2, 32, 40, 2, 8, 6
    key = jax.random.PRNGKey(0)
    k_par, k_cap, k_hid, k_enc, k_seq = jax.random.split(key, 5)

    params = init_params(k_par, hidden_size=H, output_size=O, num_layers=L)
    kparams = prepare_params(params)                    # bf16 weights, f32 biases

    caption = jax.random.randint(k_cap, (B,), 0, O, dtype=jnp.int32)
    hidden0 = jax.random.normal(k_hid, (L, B, H), jnp.float32)
    encoder_outputs = jax.random.normal(k_enc, (B, S, H), jnp.float32)  # unused by forward

    # --- single-step forward (matches the PyTorch module's forward) ---
    out, hid = vanilla_decoder_forward(caption, hidden0, encoder_outputs, kparams, O)
    out = jax.block_until_ready(out)
    hid = jax.block_until_ready(hid)

    ref_out, ref_hid = reference_forward(caption, hidden0, params,
                                         compute_dtype=jnp.bfloat16)
    assert out.shape == (B, O) and hid.shape == (L, B, H)
    assert jnp.allclose(out, ref_out, atol=1e-3, rtol=1e-3)
    assert jnp.allclose(hid, ref_hid, atol=1e-3, rtol=1e-3)

    # --- T fused decode steps in one pallas_call (teacher-forced) ---
    caps_bt = jax.random.randint(k_seq, (B, T), 0, O, dtype=jnp.int32)
    fused_logits, fused_hid = vanilla_decoder_run(caps_bt, hidden0, kparams, O)
    fused_logits = jax.block_until_ready(fused_logits)
    fused_hid = jax.block_until_ready(fused_hid)

    h_ref = hidden0
    ref_steps = []
    for t in range(T):
        lg, h_ref = reference_forward(caps_bt[:, t], h_ref, params,
                                      compute_dtype=jnp.bfloat16)
        ref_steps.append(lg)
    ref_steps = jnp.stack(ref_steps, axis=1)            # (B, T, O)

    assert fused_logits.shape == (B, T, O) and fused_hid.shape == (L, B, H)
    assert jnp.allclose(fused_logits, ref_steps, atol=1e-3, rtol=1e-3)
    assert jnp.allclose(fused_hid, h_ref, atol=1e-3, rtol=1e-3)

    print("KERNEL_OK")
</pallas_src>

<mosaic_0001>
module attributes {stable_mosaic.version = 11 : i64} {
  func.func @_gru_decoder_kernel(%arg0: i32, %arg1: memref<2xi32, #tpu.memory_space<smem>>, %arg2: memref<40x128xbf16, #tpu.memory_space<vmem>>, %arg3: memref<2x2x128xf32, #tpu.memory_space<vmem>>, %arg4: memref<2x256x512xbf16, #tpu.memory_space<vmem>>, %arg5: memref<2x1x512xf32, #tpu.memory_space<vmem>>, %arg6: memref<128x128xbf16, #tpu.memory_space<vmem>>, %arg7: memref<1x128xf32, #tpu.memory_space<vmem>>, %arg8: memref<1x2x128xf32, #tpu.memory_space<vmem>>, %arg9: memref<2x2x128xf32, #tpu.memory_space<vmem>>) attributes {dimension_semantics = [#tpu.dimension_semantics<arbitrary>], iteration_bounds = array<i64: 1>, scalar_prefetch = 1 : i64, scratch_operands = 0 : i64, tpu.core_type = #tpu.core_type<tc>, window_params = [{pipeline_mode = #tpu.pipeline_mode<synchronous>, transform_indices = @transform_0, window_bounds = array<i64: 40, 128>}, {pipeline_mode = #tpu.pipeline_mode<synchronous>, transform_indices = @transform_1, window_bounds = array<i64: 2, 2, 128>}, {pipeline_mode = #tpu.pipeline_mode<synchronous>, transform_indices = @transform_2, window_bounds = array<i64: 2, 256, 512>}, {pipeline_mode = #tpu.pipeline_mode<synchronous>, transform_indices = @transform_3, window_bounds = array<i64: 2, 1, 512>}, {pipeline_mode = #tpu.pipeline_mode<synchronous>, transform_indices = @transform_4, window_bounds = array<i64: 128, 128>}, {pipeline_mode = #tpu.pipeline_mode<synchronous>, transform_indices = @transform_5, window_bounds = array<i64: 1, 128>}, {pipeline_mode = #tpu.pipeline_mode<synchronous>, transform_indices = @transform_6, window_bounds = array<i64: 1, 2, 128>}, {pipeline_mode = #tpu.pipeline_mode<synchronous>, transform_indices = @transform_7, window_bounds = array<i64: 2, 2, 128>}]} {
    %c0 = arith.constant 0 : index
    %c0_0 = arith.constant 0 : index
    %c0_1 = arith.constant 0 : index
    %0 = vector.load %arg3[%c0, %c0_0, %c0_1] : memref<2x2x128xf32, #tpu.memory_space<vmem>>, vector<2x2x128xf32>
    %c0_2 = arith.constant 0 : index
    %c0_3 = arith.constant 0 : index
    %c0_4 = arith.constant 0 : index
    %1 = vector.load %arg9[%c0_2, %c0_3, %c0_4] : memref<2x2x128xf32, #tpu.memory_space<vmem>>, vector<2x2x128xf32>
    tpu.vector_store %arg9[%c0_2, %c0_3, %c0_4], %0 {strides = array<i32>} : memref<2x2x128xf32, #tpu.memory_space<vmem>>, vector<2x2x128xf32>,
    %c0_5 = arith.constant 0 : index
    %c0_6 = arith.constant 0 : index
    %2 = vector.load %arg2[%c0_5, %c0_6] : memref<40x128xbf16, #tpu.memory_space<vmem>>, vector<40x128xbf16>
    %c0_7 = arith.constant 0 : index
    %c0_8 = arith.constant 0 : index
    %3 = vector.load %arg6[%c0_7, %c0_8] : memref<128x128xbf16, #tpu.memory_space<vmem>>, vector<128x128xbf16>
    %c0_9 = arith.constant 0 : index
    %c0_10 = arith.constant 0 : index
    %4 = vector.load %arg7[%c0_9, %c0_10] : memref<1x128xf32, #tpu.memory_space<vmem>>, vector<1x128xf32>
    %5 = tpu.iota {dimensions = array<i32: 0>} : vector<2x40xi32>
    %6 = tpu.iota {dimensions = array<i32: 1>} : vector<2x40xi32>
    %c0_i32 = arith.constant 0 : i32
    %c1_i32 = arith.constant 1 : i32
    %7 = arith.muli %c0_i32, %c1_i32 : i32
    %c0_i32_11 = arith.constant 0 : i32
    %8 = arith.addi %c0_i32_11, %7 : i32
    %cst = arith.constant 0.000000e+00 : f32
    %9 = vector.broadcast %cst : f32 to vector<2x40xf32>
    %c2_i32 = arith.constant 2 : i32
    %10 = arith.muli %8, %c2_i32 : i32
    %c0_i32_12 = arith.constant 0 : i32
    %11 = arith.addi %10, %c0_i32_12 : i32
    %12 = arith.index_cast %11 : i32 to index
    %13 = memref.load %arg1[%12] : memref<2xi32, #tpu.memory_space<smem>>
    %c0_i32_13 = arith.constant 0 : i32
    %14 = vector.broadcast %c0_i32_13 : i32 to vector<2x40xi32>
    %15 = arith.cmpi eq, %5, %14 : vector<2x40xi32>
    %16 = vector.broadcast %13 : i32 to vector<2x40xi32>
    %17 = arith.cmpi eq, %6, %16 : vector<2x40xi32>
    %18 = arith.andi %15, %17 : vector<2x40xi1>
    %cst_14 = arith.constant 1.000000e+00 : f32
    %cst_15 = arith.constant 0.000000e+00 : f32
    %19 = vector.broadcast %cst_14 : f32 to vector<2x40xf32>
    %20 = vector.broadcast %cst_15 : f32 to vector<2x40xf32>
    %21 = arith.select %18, %19, %20 : vector<2x40xi1>, vector<2x40xf32>
    %22 = arith.addf %9, %21 : vector<2x40xf32>
    %c2_i32_16 = arith.constant 2 : i32
    %23 = arith.muli %8, %c2_i32_16 : i32
    %c1_i32_17 = arith.constant 1 : i32
    %24 = arith.addi %23, %c1_i32_17 : i32
    %25 = arith.index_cast %24 : i32 to index
    %26 = memref.load %arg1[%25] : memref<2xi32, #tpu.memory_space<smem>>
    %c1_i32_18 = arith.constant 1 : i32
    %27 = vector.broadcast %c1_i32_18 : i32 to vector<2x40xi32>
    %28 = arith.cmpi eq, %5, %27 : vector<2x40xi32>
    %29 = vector.broadcast %26 : i32 to vector<2x40xi32>
    %30 = arith.cmpi eq, %6, %29 : vector<2x40xi32>
    %31 = arith.andi %28, %30 : vector<2x40xi1>
    %cst_19 = arith.constant 1.000000e+00 : f32
    %cst_20 = arith.constant 0.000000e+00 : f32
    %32 = vector.broadcast %cst_19 : f32 to vector<2x40xf32>
    %33 = vector.broadcast %cst_20 : f32 to vector<2x40xf32>
    %34 = arith.select %31, %32, %33 : vector<2x40xi1>, vector<2x40xf32>
    %35 = arith.addf %22, %34 : vector<2x40xf32>
    %36 = arith.truncf %35 : vector<2x40xf32> to vector<2x40xbf16>
    %cst_21 = arith.constant dense<0.000000e+00> : vector<2x128xf32>
    %37 = tpu.matmul %36, %2, %cst_21 {dimension_numbers = #tpu.dot_dimension_numbers<[1], [0], [0], [1], [0, 0, 1, 1], [], []>} : vector<2x40xbf16>, vector<40x128xbf16>, vector<2x128xf32> -> vector<2x128xf32>
    %c0_22 = arith.constant 0 : index
    %c0_23 = arith.constant 0 : index
    %c0_24 = arith.constant 0 : index
    %38 = vector.load %arg9[%c0_22, %c0_23, %c0_24] : memref<2x2x128xf32, #tpu.memory_space<vmem>>, vector<1x2x128xf32>
    %39 = vector.shape_cast %38 : vector<1x2x128xf32> to vector<2x128xf32>
    %40 = tpu.concatenate %37, %39 in 1 : vector<2x128xf32>, vector<2x128xf32> -> vector<2x256xf32>
    %41 = arith.truncf %40 : vector<2x256xf32> to vector<2x256xbf16>
    %c0_25 = arith.constant 0 : index
    %c0_26 = arith.constant 0 : index
    %c0_27 = arith.constant 0 : index
    %42 = vector.load %arg4[%c0_25, %c0_26, %c0_27] : memref<2x256x512xbf16, #tpu.memory_space<vmem>>, vector<1x256x512xbf16>
    %43 = vector.shape_cast %42 : vector<1x256x512xbf16> to vector<256x512xbf16>
    %cst_28 = arith.constant dense<0.000000e+00> : vector<2x512xf32>
    %44 = tpu.matmul %41, %43, %cst_28 {dimension_numbers = #tpu.dot_dimension_numbers<[1], [0], [0], [1], [0, 0, 1, 1], [], []>} : vector<2x256xbf16>, vector<256x512xbf16>, vector<2x512xf32> -> vector<2x512xf32>
    %c0_29 = arith.constant 0 : index
    %c0_30 = arith.constant 0 : index
    %c0_31 = arith.constant 0 : index
    %45 = vector.load %arg5[%c0_29, %c0_30, %c0_31] : memref<2x1x512xf32, #tpu.memory_space<vmem>>, vector<1x1x512xf32>
    %46 = vector.shape_cast %45 : vector<1x1x512xf32> to vector<1x512xf32>
    %47 = vector.broadcast %46 : vector<1x512xf32> to vector<2x512xf32>
    %48 = arith.addf %44, %47 : vector<2x512xf32>
    %49 = vector.extract_strided_slice %48 {offsets = [0, 0], sizes = [2, 128], strides = [1, 1]} : vector<2x512xf32> to vector<2x128xf32>
    %50 = arith.negf %49 : vector<2x128xf32>
    %51 = math.exp %50 : vector<2x128xf32>
    %cst_32 = arith.constant 1.000000e+00 : f32
    %52 = vector.broadcast %cst_32 : f32 to vector<2x128xf32>
    %53 = arith.addf %52, %51 : vector<2x128xf32>
    %54 = arith.divf %52, %53 : vector<2x128xf32>
    %55 = vector.extract_strided_slice %48 {offsets = [0, 128], sizes = [2, 128], strides = [1, 1]} : vector<2x512xf32> to vector<2x128xf32>
    %56 = arith.negf %55 : vector<2x128xf32>
    %57 = math.exp %56 : vector<2x128xf32>
    %cst_33 = arith.constant 1.000000e+00 : f32
    %58 = vector.broadcast %cst_33 : f32 to vector<2x128xf32>
    %59 = arith.addf %58, %57 : vector<2x128xf32>
    %60 = arith.divf %58, %59 : vector<2x128xf32>
    %61 = vector.extract_strided_slice %48 {offsets = [0, 256], sizes = [2, 128], strides = [1, 1]} : vector<2x512xf32> to vector<2x128xf32>
    %62 = vector.extract_strided_slice %48 {offsets = [0, 384], sizes = [2, 128], strides = [1, 1]} : vector<2x512xf32> to vector<2x128xf32>
    %63 = arith.mulf %54, %62 : vector<2x128xf32>
    %64 = arith.addf %61, %63 : vector<2x128xf32>
    %65 = math.tanh %64 : vector<2x128xf32>
    %cst_34 = arith.constant 1.000000e+00 : f32
    %66 = vector.broadcast %cst_34 : f32 to vector<2x128xf32>
    %67 = arith.subf %66, %60 : vector<2x128xf32>
    %68 = arith.mulf %67, %65 : vector<2x128xf32>
    %69 = arith.mulf %60, %39 : vector<2x128xf32>
    %70 = arith.addf %68, %69 : vector<2x128xf32>
    %c0_35 = arith.constant 0 : index
    %c0_36 = arith.constant 0 : index
    %c0_37 = arith.constant 0 : index
    %71 = vector.load %arg9[%c0_35, %c0_36, %c0_37] : memref<2x2x128xf32, #tpu.memory_space<vmem>>, vector<1x2x128xf32>
    %72 = vector.shape_cast %71 : vector<1x2x128xf32> to vector<2x128xf32>
    %73 = vector.shape_cast %70 : vector<2x128xf32> to vector<1x2x128xf32>
    tpu.vector_store %arg9[%c0_35, %c0_36, %c0_37], %73 {strides = array<i32>} : memref<2x2x128xf32, #tpu.memory_space<vmem>>, vector<1x2x128xf32>,
    %c1 = arith.constant 1 : index
    %c0_38 = arith.constant 0 : index
    %c0_39 = arith.constant 0 : index
    %74 = vector.load %arg9[%c1, %c0_38, %c0_39] : memref<2x2x128xf32, #tpu.memory_space<vmem>>, vector<1x2x128xf32>
    %75 = vector.shape_cast %74 : vector<1x2x128xf32> to vector<2x128xf32>
    %76 = tpu.concatenate %70, %75 in 1 : vector<2x128xf32>, vector<2x128xf32> -> vector<2x256xf32>
    %77 = arith.truncf %76 : vector<2x256xf32> to vector<2x256xbf16>
    %c1_40 = arith.constant 1 : index
    %c0_41 = arith.constant 0 : index
    %c0_42 = arith.constant 0 : index
    %78 = vector.load %arg4[%c1_40, %c0_41, %c0_42] : memref<2x256x512xbf16, #tpu.memory_space<vmem>>, vector<1x256x512xbf16>
    %79 = vector.shape_cast %78 : vector<1x256x512xbf16> to vector<256x512xbf16>
    %cst_43 = arith.constant dense<0.000000e+00> : vector<2x512xf32>
    %80 = tpu.matmul %77, %79, %cst_43 {dimension_numbers = #tpu.dot_dimension_numbers<[1], [0], [0], [1], [0, 0, 1, 1], [], []>} : vector<2x256xbf16>, vector<256x512xbf16>, vector<2x512xf32> -> vector<2x512xf32>
    %c1_44 = arith.constant 1 : index
    %c0_45 = arith.constant 0 : index
    %c0_46 = arith.constant 0 : index
    %81 = vector.load %arg5[%c1_44, %c0_45, %c0_46] : memref<2x1x512xf32, #tpu.memory_space<vmem>>, vector<1x1x512xf32>
    %82 = vector.shape_cast %81 : vector<1x1x512xf32> to vector<1x512xf32>
    %83 = vector.broadcast %82 : vector<1x512xf32> to vector<2x512xf32>
    %84 = arith.addf %80, %83 : vector<2x512xf32>
    %85 = vector.extract_strided_slice %84 {offsets = [0, 0], sizes = [2, 128], strides = [1, 1]} : vector<2x512xf32> to vector<2x128xf32>
    %86 = arith.negf %85 : vector<2x128xf32>
    %87 = math.exp %86 : vector<2x128xf32>
    %cst_47 = arith.constant 1.000000e+00 : f32
    %88 = vector.broadcast %cst_47 : f32 to vector<2x128xf32>
    %89 = arith.addf %88, %87 : vector<2x128xf32>
    %90 = arith.divf %88, %89 : vector<2x128xf32>
    %91 = vector.extract_strided_slice %84 {offsets = [0, 128], sizes = [2, 128], strides = [1, 1]} : vector<2x512xf32> to vector<2x128xf32>
    %92 = arith.negf %91 : vector<2x128xf32>
    %93 = math.exp %92 : vector<2x128xf32>
    %cst_48 = arith.constant 1.000000e+00 : f32
    %94 = vector.broadcast %cst_48 : f32 to vector<2x128xf32>
    %95 = arith.addf %94, %93 : vector<2x128xf32>
    %96 = arith.divf %94, %95 : vector<2x128xf32>
    %97 = vector.extract_strided_slice %84 {offsets = [0, 256], sizes = [2, 128], strides = [1, 1]} : vector<2x512xf32> to vector<2x128xf32>
    %98 = vector.extract_strided_slice %84 {offsets = [0, 384], sizes = [2, 128], strides = [1, 1]} : vector<2x512xf32> to vector<2x128xf32>
    %99 = arith.mulf %90, %98 : vector<2x128xf32>
    %100 = arith.addf %97, %99 : vector<2x128xf32>
    %101 = math.tanh %100 : vector<2x128xf32>
    %cst_49 = arith.constant 1.000000e+00 : f32
    %102 = vector.broadcast %cst_49 : f32 to vector<2x128xf32>
    %103 = arith.subf %102, %96 : vector<2x128xf32>
    %104 = arith.mulf %103, %101 : vector<2x128xf32>
    %105 = arith.mulf %96, %75 : vector<2x128xf32>
    %106 = arith.addf %104, %105 : vector<2x128xf32>
    %c1_50 = arith.constant 1 : index
    %c0_51 = arith.constant 0 : index
    %c0_52 = arith.constant 0 : index
    %107 = vector.load %arg9[%c1_50, %c0_51, %c0_52] : memref<2x2x128xf32, #tpu.memory_space<vmem>>, vector<1x2x128xf32>
    %108 = vector.shape_cast %107 : vector<1x2x128xf32> to vector<2x128xf32>
    %109 = vector.shape_cast %106 : vector<2x128xf32> to vector<1x2x128xf32>
    tpu.vector_store %arg9[%c1_50, %c0_51, %c0_52], %109 {strides = array<i32>} : memref<2x2x128xf32, #tpu.memory_space<vmem>>, vector<1x2x128xf32>,
    %110 = arith.truncf %106 : vector<2x128xf32> to vector<2x128xbf16>
    %cst_53 = arith.constant dense<0.000000e+00> : vector<2x128xf32>
    %111 = tpu.matmul %110, %3, %cst_53 {dimension_numbers = #tpu.dot_dimension_numbers<[1], [0], [0], [1], [0, 0, 1, 1], [], []>} : vector<2x128xbf16>, vector<128x128xbf16>, vector<2x128xf32> -> vector<2x128xf32>
    %112 = vector.broadcast %4 : vector<1x128xf32> to vector<2x128xf32>
    %113 = arith.addf %111, %112 : vector<2x128xf32>
    %114 = vector.shape_cast %113 : vector<2x128xf32> to vector<1x2x128xf32>
    %115 = arith.index_cast %8 : i32 to index
    %c0_54 = arith.constant 0 : index
    %c0_55 = arith.constant 0 : index
    %116 = vector.load %arg8[%115, %c0_54, %c0_55] : memref<1x2x128xf32, #tpu.memory_space<vmem>>, vector<1x2x128xf32>
    tpu.vector_store %arg8[%115, %c0_54, %c0_55], %114 {strides = array<i32>} : memref<1x2x128xf32, #tpu.memory_space<vmem>>, vector<1x2x128xf32>,
    %c1_i32_56 = arith.constant 1 : i32
    return
  }
  func.func @transform_0(%arg0: i32, %arg1: memref<2xi32, #tpu.memory_space<smem>>) -> (i32, i32) {
    %c0_i32 = arith.constant 0 : i32
    %c0_i32_0 = arith.constant 0 : i32
    %c0_i32_1 = arith.constant 0 : i32
    return %c0_i32, %c0_i32_0 : i32, i32
  }
  func.func @transform_1(%arg0: i32, %arg1: memref<2xi32, #tpu.memory_space<smem>>) -> (i32, i32, i32) {
    %c0_i32 = arith.constant 0 : i32
    %c0_i32_0 = arith.constant 0 : i32
    %c0_i32_1 = arith.constant 0 : i32
    %c0_i32_2 = arith.constant 0 : i32
    return %c0_i32, %c0_i32_0, %c0_i32_1 : i32, i32, i32
  }
  func.func @transform_2(%arg0: i32, %arg1: memref<2xi32, #tpu.memory_space<smem>>) -> (i32, i32, i32) {
    %c0_i32 = arith.constant 0 : i32
    %c0_i32_0 = arith.constant 0 : i32
    %c0_i32_1 = arith.constant 0 : i32
    %c0_i32_2 = arith.constant 0 : i32
    return %c0_i32, %c0_i32_0, %c0_i32_1 : i32, i32, i32
  }
  func.func @transform_3(%arg0: i32, %arg1: memref<2xi32, #tpu.memory_space<smem>>) -> (i32, i32, i32) {
    %c0_i32 = arith.constant 0 : i32
    %c0_i32_0 = arith.constant 0 : i32
    %c0_i32_1 = arith.constant 0 : i32
    %c0_i32_2 = arith.constant 0 : i32
    return %c0_i32, %c0_i32_0, %c0_i32_1 : i32, i32, i32
  }
  func.func @transform_4(%arg0: i32, %arg1: memref<2xi32, #tpu.memory_space<smem>>) -> (i32, i32) {
    %c0_i32 = arith.constant 0 : i32
    %c0_i32_0 = arith.constant 0 : i32
    %c0_i32_1 = arith.constant 0 : i32
    return %c0_i32, %c0_i32_0 : i32, i32
  }
  func.func @transform_5(%arg0: i32, %arg1: memref<2xi32, #tpu.memory_space<smem>>) -> (i32, i32) {
    %c0_i32 = arith.constant 0 : i32
    %c0_i32_0 = arith.constant 0 : i32
    %c0_i32_1 = arith.constant 0 : i32
    return %c0_i32, %c0_i32_0 : i32, i32
  }
  func.func @transform_6(%arg0: i32, %arg1: memref<2xi32, #tpu.memory_space<smem>>) -> (i32, i32, i32) {
    %c0_i32 = arith.constant 0 : i32
    %c0_i32_0 = arith.constant 0 : i32
    %c0_i32_1 = arith.constant 0 : i32
    %c0_i32_2 = arith.constant 0 : i32
    return %c0_i32, %c0_i32_0, %c0_i32_1 : i32, i32, i32
  }
  func.func @transform_7(%arg0: i32, %arg1: memref<2xi32, #tpu.memory_space<smem>>) -> (i32, i32, i32) {
    %c0_i32 = arith.constant 0 : i32
    %c0_i32_0 = arith.constant 0 : i32
    %c0_i32_1 = arith.constant 0 : i32
    %c0_i32_2 = arith.constant 0 : i32
    return %c0_i32, %c0_i32_0, %c0_i32_1 : i32, i32, i32
  }
}

</mosaic_0001>

<bundles_post_ra>
// kernel: tpu_custom_call.1
= control target key start
LH: loop header
LB: loop body
LE: loop exit
PB: predicated region body
PF: predicated region fallthrough
CT: control target
= control target key end

     0   :  { %s1951_s27 = smov [#allocation3]   ;;  %s2105_s0 = inlined_call_operand.hbm [shape: s32[2], index: 0, kind: input, shape index: {}]   ;;  %s2106_s1 = inlined_call_operand.hbm [shape: bf16[40,128], index: 1, kind: input, shape index: {}]   ;;  %s2107_s2 = inlined_call_operand.hbm [shape: f32[2,2,128], index: 2, kind: input, shape index: {}]   ;;  %s2108_s3 = inlined_call_operand.hbm [shape: bf16[2,256,512], index: 3, kind: input, shape index: {}]   ;;  %s2109_s4 = inlined_call_operand.hbm [shape: f32[2,1,512], index: 4, kind: input, shape index: {}]   ;;  %s2110_s5 = inlined_call_operand.hbm [shape: bf16[128,128], index: 5, kind: input, shape index: {}]   ;;  %s2111_s6 = inlined_call_operand.vmem [shape: f32[1,128], index: 6, kind: input, shape index: {}]   ;;  %s2112_s7 = inlined_call_operand.hbm [shape: f32[1,2,128], index: 7, kind: output, shape index: {0}]   ;;  %s2113_s8 = inlined_call_operand.hbm [shape: f32[2,2,128], index: 8, kind: output, shape index: {1}]  }
   0x1   :  { %15 = dma.hbm_to_smem %s2105_s0, 16, %s1951_s27, [#allocation2] }
   0x2   :  { %1939 = dma.done.wait [#allocation2], 16 }
   0x3   :  { %1940 = vsyncadd [#allocation2], 4294967280 }
   0x4   :  { %17 = sfence }
   0x5   :  { %18 = vsyncpa [#allocation5], 0 }
   0x6   :  { %19 = vsyncpa [#allocation8], 0 }
   0x7   :  { %20 = vsyncpa [#allocation11], 0 }
   0x8   :  { %21 = vsyncpa [#allocation6], 0 }
   0x9   :  { %22 = vsyncpa [#allocation15], 0  ;;  %s1952_s30 = smov [#allocation7]  }
   0xa   :  { %s40_s9 = sshll.u32 %s1952_s30, 4  ;;  %s41_s9 = int_to_ptr.vmem [resolvable:$true] %s40_s9 }
   0xb   :  { %s1807_s10 = scalar_lea.vmem %s41_s9, 64  ;;  %p1812_p1 = scmp.lt.s32.totalorder %s41_s9, %s41_s9 }
   0xc   :  { %p1808_p0 = scmp.ne.s32.totalorder %s41_s9, %s1807_s10  ;;  %p1813_p2 = scmp.lt.s32.totalorder %s1807_s10, %s1807_s10 }
   0xe   :  { %p1814_p3 = por %p1813_p2, %p1812_p1 }
  0x10   :  { %p1815_p4 = pnand %p1814_p3, %p1808_p0 }
  0x12   :  { %1818 = shalt.err (!%p1815_p4)
}
  0x13   :  { %s1953_s11 = smov 32   ;;  %s1954_s0 = smov 2  }
  0x14   :  { %46 = dma.hbm_to_vmem [thread:$0]  %s2107_s2, 64, %s41_s9, [#allocation8], %s1953_s11, %s1953_s11, %s1954_s0  }
  0x15   :  { %s1955_s14 = smov [#allocation10]   ;;  %s1956_s16 = smov [#allocation4]  }
  0x16   :  { %s64_s15 = sshll.u32 %s1955_s14, 4  ;;  %s28_s17 = sshll.u32 %s1956_s16, 4  ;;  %s65_s15 = int_to_ptr.vmem [resolvable:$true] %s64_s15  ;;  %s29_s17 = int_to_ptr.vmem [resolvable:$true] %s28_s17 }
  0x17   :  { %s1827_s18 = scalar_lea.vmem %s65_s15, 128  ;;  %p1832_p6 = scmp.lt.s32.totalorder %s65_s15, %s65_s15 }
  0x18   :  { %p1828_p5 = scmp.ne.s32.totalorder %s65_s15, %s1827_s18  ;;  %p1833_p7 = scmp.lt.s32.totalorder %s1827_s18, %s1827_s18 }
  0x1a   :  { %p1834_p8 = por %p1833_p7, %p1832_p6 }
  0x1c   :  { %p1835_p9 = pnand %p1834_p8, %p1828_p5 }
  0x1e   :  { %1838 = shalt.err (!%p1835_p9)
}
  0x1f   :  { %s1957_s19 = smov 64   ;;  %s1958_s20 = smov 4  }
  0x20   :  { %70 = dma.hbm_to_vmem [thread:$0]  %s2109_s4, 128, %s65_s15, [#allocation11], %s1957_s19, %s1957_s19, %s1958_s20  }
  0x21   :  { %s1847_s2 = scalar_lea.vmem %s29_s17, 320  ;;  %p1852_p11 = scmp.lt.s32.totalorder %s29_s17, %s29_s17 }
  0x22   :  { %p1848_p10 = scmp.ne.s32.totalorder %s29_s17, %s1847_s2  ;;  %p1853_p12 = scmp.lt.s32.totalorder %s1847_s2, %s1847_s2 }
  0x24   :  { %p1854_p13 = por %p1853_p12, %p1852_p11 }
  0x26   :  { %p1855_p0 = pnand %p1854_p13, %p1848_p10 }
  0x28   :  { %1858 = shalt.err (!%p1855_p0)
}
  0x29   :  { %34 = dma.hbm_to_vmem [thread:$0]  %s2106_s1, 320, %s29_s17, [#allocation5], %s1957_s19, %s1957_s19, %s1958_s20  }
  0x2a   :  { %s1959_s25 = smov [#allocation9]  }
  0x2b   :  { %s52_s26 = sshll.u32 %s1959_s25, 4  ;;  %s53_s26 = int_to_ptr.vmem [resolvable:$true] %s52_s26 }
  0x2c   :  { %s1867_s27 = scalar_lea.vmem %s53_s26, 16384  ;;  %p1872_p2 = scmp.lt.s32.totalorder %s53_s26, %s53_s26 }
  0x2d   :  { %p1868_p1 = scmp.ne.s32.totalorder %s53_s26, %s1867_s27  ;;  %p1873_p3 = scmp.lt.s32.totalorder %s1867_s27, %s1867_s27 }
  0x2f   :  { %p1874_p4 = por %p1873_p3, %p1872_p2 }
  0x31   :  { %p1875_p5 = pnand %p1874_p4, %p1868_p1 }
  0x33   :  { %1878 = shalt.err (!%p1875_p5)
}
  0x34   :  { %s1960_s4 = smov 256   ;;  %s1961_s28 = smov 16  }
  0x35   :  { %58 = dma.hbm_to_vmem [thread:$0]  %s2108_s3, 16384, %s53_s26, [#allocation8], %s1960_s4, %s1960_s4, %s1961_s28  }
  0x36   :  { %s1962_s9 = smov [#allocation12]  }
  0x37   :  { %s76_s10 = sshll.u32 %s1962_s9, 4  ;;  %s77_s10 = int_to_ptr.vmem [resolvable:$true] %s76_s10 }
  0x38   :  { %s1887_s1 = scalar_lea.vmem %s77_s10, 1024  ;;  %p1892_p7 = scmp.lt.s32.totalorder %s77_s10, %s77_s10 }
  0x39   :  { %p1888_p6 = scmp.ne.s32.totalorder %s77_s10, %s1887_s1  ;;  %p1893_p8 = scmp.lt.s32.totalorder %s1887_s1, %s1887_s1 }
  0x3b   :  { %p1894_p9 = por %p1893_p8, %p1892_p7 }
  0x3d   :  { %p1895_p10 = pnand %p1894_p9, %p1888_p6 }
  0x3f   :  { %1898 = shalt.err (!%p1895_p10)
}
  0x40   :  { %82 = dma.hbm_to_vmem [thread:$0]  %s2110_s5, 1024, %s77_s10, [#allocation11], %s1957_s19, %s1957_s19, %s1958_s20  }
  0x41   :  { %1941 = dma.done.wait [#allocation5], 320  }
  0x42   :  { %1942 = vsyncadd [#allocation5], 4294966976 }
  0x43   :  { %1943 = dma.done.wait [#allocation8], 16448  }
  0x44   :  { %1944 = vsyncadd [#allocation8], 4294950848 }
  0x45   :  { %1945 = dma.done.wait [#allocation11], 1152  }
  0x46   :  { %1946 = vsyncadd [#allocation11], 4294966144  ;;  %v127_v0 = vlaneseq  ;;  %v1963_v1 = vmov 0.0   ;;  %vm1964_vm0 = vmmov 0   ;;  %s131_s3 = sld [smem:[#allocation3]]  ;;  %vm165_vm1 = vcmask 1043456  }
  0x47   :  { %1522 = vmatprep.subr.bf16.mxu0 %v1963_v1  ;;  %1528 = vmatprep.mubr.msk.bf16.mxu0 %vm1964_vm0, %v1963_v1  ;;  %s1363_s14 = sld [smem:[#allocation3 + $0x1]]  ;;  %v1568_v4 = vld [vmem:[#allocation4 + $0x10] ss:$0 sps:$4 sm:$0xff]   ;;  %v1569_v8 = vld [vmem:[#allocation4 + $0x8] sm:$0xff]   ;;  %v1570_v15 = vld [vmem:[#allocation4] sm:$0xff]   ;;  %vm161_vm8 = vcmask 326656  }
  0x48   :  { %v2045_v2 = vshrl.u32 %v127_v0, 7  ;;  %v130_v3 = vand.u32 127, %v127_v0  ;;  %v167_v7 = vsel %vm165_vm1, %v1568_v4, 0  ;;  %v1571_v11 = vld [vmem:[#allocation9 + $0xe4] ss:$16 sps:$4 sm:$0xff]   ;;  %s1965_s5 = smov [#allocation14]  }
  0x49   :  { %1523 = vmatpush3.bf16.msra.mxu0 %v167_v7  ;;  %v1576_v12 = vld [vmem:[#allocation9 + $0xe0] ss:$16 sps:$4 sm:$0xff]   ;;  %618 = vmatprep.subr.bf16.mxu1 %v1571_v11  ;;  %v1577_v14 = vld [vmem:[#allocation9 + $0xc4] ss:$16 sps:$4 sm:$0xff]   ;;  %v1575_v16 = vld [vmem:[#allocation9 + $0xec] ss:$16 sps:$4 sm:$0xff]  }
  0x4a   :  { %vm132_vm2 = vcmp.eq.s32.totalorder %v2045_v2, 0  ;;  %vm139_vm3 = vcmp.eq.s32.totalorder %v2045_v2, 1  ;;  %1524 = vmatprep.subr.bf16.mxu0 %v1963_v1  ;;  %619 = vmatpush1.bf16.msra.mxu1 %v1576_v12  ;;  %v1582_v17 = vld [vmem:[#allocation9 + $0xc0] ss:$16 sps:$4 sm:$0xff]   ;;  %v1583_v18 = vld [vmem:[#allocation9 + $0xa4] ss:$16 sps:$4 sm:$0xff]  }
  0x4b   :  { %620 = vmatprep.subr.bf16.mxu1 %v1577_v14  ;;  %v1573_v20 = vld [vmem:[#allocation9 + $0xe8] ss:$16 sps:$4 sm:$0xff]   ;;  %v1581_v21 = vld [vmem:[#allocation9 + $0xcc] ss:$16 sps:$4 sm:$0xff]   ;;  %v1588_v22 = vld [vmem:[#allocation9 + $0xa0] ss:$16 sps:$4 sm:$0xff]  }
  0x4c   :  { %v133_v5 = vstv %s131_s3  ;;  %v1589_v23 = vld [vmem:[#allocation9 + $0x84] ss:$16 sps:$4 sm:$0xff]   ;;  %v1579_v24 = vld [vmem:[#allocation9 + $0xc8] ss:$16 sps:$4 sm:$0xff]   ;;  %v1594_v25 = vld [vmem:[#allocation9 + $0x80] ss:$16 sps:$4 sm:$0xff]  }
  0x4d   :  { %vm134_vm4 = vcmp.eq.s32.totalorder %v130_v3, %v133_v5  ;;  %v140_v6 = vstv %s1363_s14  ;;  %1525 = vmatpush3.bf16.msra.mxu0 %v1569_v8  ;;  %v1587_v26 = vld [vmem:[#allocation9 + $0xac] ss:$16 sps:$4 sm:$0xff]   ;;  %v1595_v27 = vld [vmem:[#allocation9 + $0x64] ss:$16 sps:$4 sm:$0xff]   ;;  %v1585_v28 = vld [vmem:[#allocation9 + $0xa8] ss:$16 sps:$4 sm:$0xff]  }
  0x4e   :  { %vm135_vm5 = vmand %vm132_vm2, %vm134_vm4  ;;  %vm141_vm6 = vcmp.eq.s32.totalorder %v130_v3, %v140_v6  ;;  %1526 = vmatprep.subr.bf16.mxu0 %v1963_v1  ;;  %621 = vmatpush1.bf16.msra.mxu1 %v1582_v17  ;;  %v1593_v29 = vld [vmem:[#allocation9 + $0x8c] ss:$16 sps:$4 sm:$0xff]   ;;  %v1600_v30 = vld [vmem:[#allocation9 + $0x60] ss:$16 sps:$4 sm:$0xff]   ;;  %s1345_s15 = sshll.u32 %s1965_s5, 4  ;;  %s1346_s15 = int_to_ptr.vmem [resolvable:$true] %s1345_s15 }
  0x4f   :  { %v136_v9 = vsel %vm135_vm5, 1.0, %v1963_v1  ;;  %vm142_vm7 = vmand %vm139_vm3, %vm141_vm6  ;;  %622 = vmatprep.subr.bf16.mxu1 %v1583_v18  ;;  %v1601_v31 = vld [vmem:[#allocation9 + $0x44] ss:$16 sps:$4 sm:$0xff]   ;;  %v1591_v32 = vld [vmem:[#allocation9 + $0x88] ss:$16 sps:$4 sm:$0xff]   ;;  %s1899_s16 = scalar_lea.vmem %s1346_s15, 64  ;;  %p1904_p12 = scmp.lt.s32.totalorder %s1346_s15, %s1346_s15 }
  0x50   :  { %v143_v10 = vsel %vm142_vm7, 1.0, %v1963_v1  ;;  %v1606_v33 = vld [vmem:[#allocation9 + $0x40] ss:$16 sps:$4 sm:$0xff]   ;;  %v1599_v34 = vld [vmem:[#allocation9 + $0x6c] ss:$16 sps:$4 sm:$0xff]   ;;  %p1900_p11 = scmp.ne.s32.totalorder %s1346_s15, %s1899_s16  ;;  %p1905_p13 = scmp.lt.s32.totalorder %s1899_s16, %s1899_s16 }
  0x51   :  { %v144_v13 = vadd.f32 %v143_v10, %v136_v9  ;;  %1527 = vmatpush3.bf16.msra.mxu0 %v1570_v15  ;;  %v1607_v35 = vld [vmem:[#allocation9 + $0x24] ss:$16 sps:$4 sm:$0xff]   ;;  %v1597_v36 = vld [vmem:[#allocation9 + $0x68] ss:$16 sps:$4 sm:$0xff]   ;;  %v1605_v37 = vld [vmem:[#allocation9 + $0x4c] ss:$16 sps:$4 sm:$0xff]  }
  0x52   :  { %659 = vmatprep.subr.bf16.mxu0 %v1575_v16  ;;  %623 = vmatpush1.bf16.msra.mxu1 %v1588_v22  ;;  %v1612_v38 = vld [vmem:[#allocation9 + $0x20] ss:$16 sps:$4 sm:$0xff]   ;;  %v1613_v39 = vld [vmem:[#allocation9 + $0x4] ss:$16 sps:$4 sm:$0xff]   ;;  %v1603_v40 = vld [vmem:[#allocation9 + $0x48] ss:$16 sps:$4 sm:$0xff]   ;;  %p1906_p0 = por %p1905_p13, %p1904_p12 }
  0x53   :  { %v145_v19 = vpack.c.bf16 %v144_v13, %v144_v13  ;;  %624 = vmatprep.subr.bf16.mxu1 %v1589_v23  ;;  %v1618_v41 = vld [vmem:[#allocation9] ss:$16 sps:$4 sm:$0xff]   ;;  %v1611_v42 = vld [vmem:[#allocation9 + $0x2c] ss:$16 sps:$4 sm:$0xff]   ;;  %v1619_v43 = vld [vmem:[#allocation9 + $0x1e4] ss:$16 sps:$4 sm:$0xff]  }
  0x54   :  { %v1609_v44 = vld [vmem:[#allocation9 + $0x28] ss:$16 sps:$4 sm:$0xff]   ;;  %v1617_v45 = vld [vmem:[#allocation9 + $0xc] ss:$16 sps:$4 sm:$0xff]   ;;  %v1624_v46 = vld [vmem:[#allocation9 + $0x1e0] ss:$16 sps:$4 sm:$0xff]   ;;  %p1907_p1 = pnand %p1906_p0, %p1900_p11 }
  0x55   :  { %1529 = vmatmul.mubr.msk.bf16.vlgmr.msra.gmra.mxu0 %vm161_vm8, %v145_v19  ;;  %v1625_v47 = vld [vmem:[#allocation9 + $0x1c4] ss:$16 sps:$4 sm:$0xff]   ;;  %v1615_v48 = vld [vmem:[#allocation9 + $0x8] ss:$16 sps:$4 sm:$0xff]   ;;  %v1630_v49 = vld [vmem:[#allocation9 + $0x1c0] ss:$16 sps:$4 sm:$0xff]  }
  0x56   :  { %660 = vmatpush1.bf16.msra.mxu0 %v1573_v20  ;;  %625 = vmatpush1.bf16.msra.mxu1 %v1594_v25  ;;  %v1623_v50 = vld [vmem:[#allocation9 + $0x1ec] ss:$16 sps:$4 sm:$0xff]   ;;  %v1631_v51 = vld [vmem:[#allocation9 + $0x1a4] ss:$16 sps:$4 sm:$0xff]   ;;  %v1621_v52 = vld [vmem:[#allocation9 + $0x1e8] ss:$16 sps:$4 sm:$0xff]  }
  0x57   :  { %661 = vmatprep.subr.bf16.mxu0 %v1581_v21  ;;  %626 = vmatprep.subr.bf16.mxu1 %v1595_v27  ;;  %v1629_v53 = vld [vmem:[#allocation9 + $0x1cc] ss:$16 sps:$4 sm:$0xff]   ;;  %v1636_v54 = vld [vmem:[#allocation9 + $0x1a0] ss:$16 sps:$4 sm:$0xff]   ;;  %v1637_v55 = vld [vmem:[#allocation9 + $0x184] ss:$16 sps:$4 sm:$0xff]  }
  0x58   :  { %v1627_v56 = vld [vmem:[#allocation9 + $0x1c8] ss:$16 sps:$4 sm:$0xff]   ;;  %v1642_v57 = vld [vmem:[#allocation9 + $0x180] ss:$16 sps:$4 sm:$0xff]   ;;  %v1635_v58 = vld [vmem:[#allocation9 + $0x1ac] ss:$16 sps:$4 sm:$0xff]  }
  0x59   :  { %v1643_v59 = vld [vmem:[#allocation9 + $0x164] ss:$16 sps:$4 sm:$0xff]   ;;  %v1633_v60 = vld [vmem:[#allocation9 + $0x1a8] ss:$16 sps:$4 sm:$0xff]   ;;  %v1648_v61 = vld [vmem:[#allocation9 + $0x160] ss:$16 sps:$4 sm:$0xff]  }
  0x5a   :  { %662 = vmatpush1.bf16.msra.mxu0 %v1579_v24  ;;  %627 = vmatpush1.bf16.msra.mxu1 %v1600_v30  ;;  %v1641_v62 = vld [vmem:[#allocation9 + $0x18c] ss:$16 sps:$4 sm:$0xff]   ;;  %v1649_v63 = vld [vmem:[#allocation9 + $0x144] ss:$16 sps:$4 sm:$0xff]   ;;  %v1639_v0 = vld [vmem:[#allocation9 + $0x188] ss:$16 sps:$4 sm:$0xff]  }
  0x5b   :  { %663 = vmatprep.subr.bf16.mxu0 %v1587_v26  ;;  %628 = vmatprep.subr.bf16.mxu1 %v1601_v31  ;;  %v1654_v3 = vld [vmem:[#allocation9 + $0x140] ss:$16 sps:$4 sm:$0xff]   ;;  %v1647_v4 = vld [vmem:[#allocation9 + $0x16c] ss:$16 sps:$4 sm:$0xff]   ;;  %v1655_v5 = vld [vmem:[#allocation9 + $0x124] ss:$16 sps:$4 sm:$0xff]  }
  0x5c   :  { %v1645_v6 = vld [vmem:[#allocation9 + $0x168] ss:$16 sps:$4 sm:$0xff]   ;;  %v1660_v7 = vld [vmem:[#allocation9 + $0x120] ss:$16 sps:$4 sm:$0xff]   ;;  %v1653_v8 = vld [vmem:[#allocation9 + $0x14c] ss:$16 sps:$4 sm:$0xff]  }
  0x5d   :  { %v1661_v9 = vld [vmem:[#allocation9 + $0x104] ss:$16 sps:$4 sm:$0xff]   ;;  %v1651_v10 = vld [vmem:[#allocation9 + $0x148] ss:$16 sps:$4 sm:$0xff]   ;;  %v1659_v11 = vld [vmem:[#allocation9 + $0x12c] ss:$16 sps:$4 sm:$0xff]  }
  0x5e   :  { %664 = vmatpush1.bf16.msra.mxu0 %v1585_v28  ;;  %629 = vmatpush1.bf16.msra.mxu1 %v1606_v33  ;;  %v1657_v12 = vld [vmem:[#allocation9 + $0x128] ss:$16 sps:$4 sm:$0xff]   ;;  %v1665_v13 = vld [vmem:[#allocation9 + $0x10c] ss:$16 sps:$4 sm:$0xff]   ;;  %v1666_v16 = vld [vmem:[#allocation9 + $0x100] ss:$16 sps:$4 sm:$0xff]  }
  0x5f   :  { %665 = vmatprep.subr.bf16.mxu0 %v1593_v29  ;;  %630 = vmatprep.subr.bf16.mxu1 %v1607_v35  ;;  %v1663_v14 = vld [vmem:[#allocation9 + $0x108] ss:$16 sps:$4 sm:$0xff]   ;;  %v101_v15 = vld [vmem:[#allocation7] sm:$0xf]   ;;  %v1669_v19 = vld [vmem:[#allocation9 + $0x2e4] ss:$16 sps:$4 sm:$0xff]  }
  0x60   :  { %103 = vst [vmem:[#allocation14] sm:$0xf] %v101_v15   ;;  %v1672_v20 = vld [vmem:[#allocation9 + $0x2ec] ss:$16 sps:$4 sm:$0xff]   ;;  %v1667_v22 = vld [vmem:[#allocation9 + $0x2e0] ss:$16 sps:$4 sm:$0xff]  }
  0x61   :  { %v1670_v23 = vld [vmem:[#allocation9 + $0x2e8] ss:$16 sps:$4 sm:$0xff]   ;;  %v1675_v25 = vld [vmem:[#allocation9 + $0x2c4] ss:$16 sps:$4 sm:$0xff]   ;;  %v1678_v26 = vld [vmem:[#allocation9 + $0x2cc] ss:$16 sps:$4 sm:$0xff]  }
  0x62   :  { %666 = vmatpush1.bf16.msra.mxu0 %v1591_v32  ;;  %631 = vmatpush1.bf16.msra.mxu1 %v1612_v38  ;;  %v1673_v29 = vld [vmem:[#allocation9 + $0x2c0] ss:$16 sps:$4 sm:$0xff]   ;;  %v1676_v30 = vld [vmem:[#allocation9 + $0x2c8] ss:$16 sps:$4 sm:$0xff]   ;;  %v1681_v32 = vld [vmem:[#allocation9 + $0x2a4] ss:$16 sps:$4 sm:$0xff]  }
  0x63   :  { %667 = vmatprep.subr.bf16.mxu0 %v1599_v34  ;;  %632 = vmatprep.subr.bf16.mxu1 %v1613_v39  ;;  %v1684_v33 = vld [vmem:[#allocation9 + $0x2ac] ss:$16 sps:$4 sm:$0xff]   ;;  %v1679_v34 = vld [vmem:[#allocation9 + $0x2a0] ss:$16 sps:$4 sm:$0xff]   ;;  %v1682_v35 = vld [vmem:[#allocation9 + $0x2a8] ss:$16 sps:$4 sm:$0xff]  }
  0x64   :  { %v1685_v38 = vld [vmem:[#allocation9 + $0x280] ss:$16 sps:$4 sm:$0xff]   ;;  %v1688_v39 = vld [vmem:[#allocation9 + $0x288] ss:$16 sps:$4 sm:$0xff]   ;;  %v1750_v15 = vld [vmem:[#allocation9 + $0x34c] ss:$16 sps:$4 sm:$0xff]  }
  0x66   :  { %668 = vmatpush1.bf16.msra.mxu0 %v1597_v36  ;;  %633 = vmatpush1.bf16.msra.mxu1 %v1618_v41  ;;  %v1687_v36 = vld [vmem:[#allocation9 + $0x284] ss:$16 sps:$4 sm:$0xff]   ;;  %v1696_v41 = vld [vmem:[#allocation9 + $0x26c] ss:$16 sps:$4 sm:$0xff]  }
  0x67   :  { %669 = vmatprep.subr.bf16.mxu0 %v1605_v37  ;;  %634 = vmatprep.subr.bf16.mxu1 %v1619_v43  ;;  %v2053_v17 = vld [vmem:[#allocation14] sm:$0x3]  ;;  %v1690_v37 = vld [vmem:[#allocation9 + $0x28c] ss:$16 sps:$4 sm:$0xff]  }
  0x68   :  { %v211_v18 = vpack.c.bf16 %v2053_v17, %v2053_v17  ;;  %v1694_v43 = vld [vmem:[#allocation9 + $0x268] ss:$16 sps:$4 sm:$0xff]  }
  0x6a   :  { %670 = vmatpush1.bf16.msra.mxu0 %v1603_v40  ;;  %635 = vmatpush2.bf16.msra.mxu1 %v1624_v46  ;;  %v1693_v40 = vld [vmem:[#allocation9 + $0x264] ss:$16 sps:$4 sm:$0xff]   ;;  %v1697_v46 = vld [vmem:[#allocation9 + $0x240] ss:$16 sps:$4 sm:$0xff]  }
  0x6b   :  { %671 = vmatprep.subr.bf16.mxu0 %v1611_v42  ;;  %636 = vmatprep.subr.bf16.mxu1 %v1625_v47  ;;  %v1691_v42 = vld [vmem:[#allocation9 + $0x260] ss:$16 sps:$4 sm:$0xff]   ;;  %v1700_v47 = vld [vmem:[#allocation9 + $0x248] ss:$16 sps:$4 sm:$0xff]  }
  0x6c   :  { %650 = vmatprep.mubr.bf16.mxu1 %v211_v18  ;;  %691 = vmatprep.mubr.bf16.mxu0 %v211_v18  ;;  %v1748_v18 = vld [vmem:[#allocation9 + $0x348] ss:$16 sps:$4 sm:$0xff]  }
  0x6e   :  { %672 = vmatpush1.bf16.msra.mxu0 %v1609_v44  ;;  %637 = vmatpush2.bf16.msra.mxu1 %v1630_v49  ;;  %v1699_v44 = vld [vmem:[#allocation9 + $0x244] ss:$16 sps:$4 sm:$0xff]   ;;  %v1708_v49 = vld [vmem:[#allocation9 + $0x22c] ss:$16 sps:$4 sm:$0xff]  }
  0x6f   :  { %673 = vmatprep.subr.bf16.mxu0 %v1617_v45  ;;  %638 = vmatprep.subr.bf16.mxu1 %v1631_v51  ;;  %v1702_v45 = vld [vmem:[#allocation9 + $0x24c] ss:$16 sps:$4 sm:$0xff]   ;;  %v1706_v51 = vld [vmem:[#allocation9 + $0x228] ss:$16 sps:$4 sm:$0xff]  }
  0x72   :  { %674 = vmatpush1.bf16.msra.mxu0 %v1615_v48  ;;  %639 = vmatpush2.bf16.msra.mxu1 %v1636_v54  ;;  %v1705_v48 = vld [vmem:[#allocation9 + $0x224] ss:$16 sps:$4 sm:$0xff]   ;;  %v1709_v54 = vld [vmem:[#allocation9 + $0x200] ss:$16 sps:$4 sm:$0xff]  }
  0x73   :  { %675 = vmatprep.subr.bf16.mxu0 %v1623_v50  ;;  %640 = vmatprep.subr.bf16.mxu1 %v1637_v55  ;;  %v1703_v50 = vld [vmem:[#allocation9 + $0x220] ss:$16 sps:$4 sm:$0xff]   ;;  %v1712_v55 = vld [vmem:[#allocation9 + $0x208] ss:$16 sps:$4 sm:$0xff]  }
  0x76   :  { %676 = vmatpush2.bf16.msra.mxu0 %v1621_v52  ;;  %641 = vmatpush2.bf16.msra.mxu1 %v1642_v57  ;;  %v1711_v52 = vld [vmem:[#allocation9 + $0x204] ss:$16 sps:$4 sm:$0xff]   ;;  %v1720_v57 = vld [vmem:[#allocation9 + $0x3ec] ss:$16 sps:$4 sm:$0xff]  }
  0x77   :  { %677 = vmatprep.subr.bf16.mxu0 %v1629_v53  ;;  %642 = vmatprep.subr.bf16.mxu1 %v1643_v59  ;;  %v1714_v53 = vld [vmem:[#allocation9 + $0x20c] ss:$16 sps:$4 sm:$0xff]   ;;  %v1718_v59 = vld [vmem:[#allocation9 + $0x3e8] ss:$16 sps:$4 sm:$0xff]  }
  0x7a   :  { %678 = vmatpush2.bf16.msra.mxu0 %v1627_v56  ;;  %643 = vmatpush2.bf16.msra.mxu1 %v1648_v61  ;;  %v1717_v56 = vld [vmem:[#allocation9 + $0x3e4] ss:$16 sps:$4 sm:$0xff]   ;;  %v1726_v61 = vld [vmem:[#allocation9 + $0x3cc] ss:$16 sps:$4 sm:$0xff]  }
  0x7b   :  { %679 = vmatprep.subr.bf16.mxu0 %v1635_v58  ;;  %644 = vmatprep.subr.bf16.mxu1 %v1649_v63  ;;  %v1715_v58 = vld [vmem:[#allocation9 + $0x3e0] ss:$16 sps:$4 sm:$0xff]   ;;  %v1724_v63 = vld [vmem:[#allocation9 + $0x3c8] ss:$16 sps:$4 sm:$0xff]  }
  0x7e   :  { %680 = vmatpush2.bf16.msra.mxu0 %v1633_v60  ;;  %645 = vmatpush2.bf16.msra.mxu1 %v1654_v3  ;;  %v1723_v60 = vld [vmem:[#allocation9 + $0x3c4] ss:$16 sps:$4 sm:$0xff]   ;;  %v1732_v3 = vld [vmem:[#allocation9 + $0x3ac] ss:$16 sps:$4 sm:$0xff]  }
  0x7f   :  { %681 = vmatprep.subr.bf16.mxu0 %v1641_v62  ;;  %646 = vmatprep.subr.bf16.mxu1 %v1655_v5  ;;  %v1721_v62 = vld [vmem:[#allocation9 + $0x3c0] ss:$16 sps:$4 sm:$0xff]   ;;  %v1730_v5 = vld [vmem:[#allocation9 + $0x3a8] ss:$16 sps:$4 sm:$0xff]  }
  0x82   :  { %682 = vmatpush2.bf16.msra.mxu0 %v1639_v0  ;;  %647 = vmatpush2.bf16.msra.mxu1 %v1660_v7  ;;  %v1729_v0 = vld [vmem:[#allocation9 + $0x3a4] ss:$16 sps:$4 sm:$0xff]   ;;  %v1738_v7 = vld [vmem:[#allocation9 + $0x38c] ss:$16 sps:$4 sm:$0xff]  }
  0x83   :  { %683 = vmatprep.subr.bf16.mxu0 %v1647_v4  ;;  %648 = vmatprep.subr.bf16.mxu1 %v1661_v9  ;;  %v1727_v4 = vld [vmem:[#allocation9 + $0x3a0] ss:$16 sps:$4 sm:$0xff]   ;;  %v1736_v9 = vld [vmem:[#allocation9 + $0x388] ss:$16 sps:$4 sm:$0xff]  }
  0x86   :  { %684 = vmatpush2.bf16.msra.mxu0 %v1645_v6  ;;  %649 = vmatpush2.bf16.msra.mxu1 %v1666_v16  ;;  %v1735_v6 = vld [vmem:[#allocation9 + $0x384] ss:$16 sps:$4 sm:$0xff]   ;;  %v1745_v16 = vld [vmem:[#allocation9 + $0x340] ss:$16 sps:$4 sm:$0xff]  }
  0x87   :  { %685 = vmatprep.subr.bf16.mxu0 %v1653_v8  ;;  %1132 = vmatprep.subr.bf16.mxu1 %v1669_v19  ;;  %v1733_v8 = vld [vmem:[#allocation9 + $0x380] ss:$16 sps:$4 sm:$0xff]   ;;  %v2057_v19 = vld [vmem:[#allocation14 + $0x2] sm:$0x3] }
  0x8a   :  { %686 = vmatpush2.bf16.msra.mxu0 %v1651_v10  ;;  %v1741_v10 = vld [vmem:[#allocation9 + $0x364] ss:$16 sps:$4 sm:$0xff]  }
  0x8b   :  { %687 = vmatprep.subr.bf16.mxu0 %v1659_v11  ;;  %v1739_v11 = vld [vmem:[#allocation9 + $0x360] ss:$16 sps:$4 sm:$0xff]  }
  0x8e   :  { %688 = vmatpush2.bf16.msra.mxu0 %v1657_v12  ;;  %v1742_v12 = vld [vmem:[#allocation9 + $0x368] ss:$16 sps:$4 sm:$0xff]  }
  0x8f   :  { %689 = vmatprep.subr.bf16.mxu0 %v1665_v13  ;;  %v1744_v13 = vld [vmem:[#allocation9 + $0x36c] ss:$16 sps:$4 sm:$0xff]  }
  0x92   :  { %690 = vmatpush2.bf16.msra.mxu0 %v1663_v14  ;;  %v1747_v14 = vld [vmem:[#allocation9 + $0x344] ss:$16 sps:$4 sm:$0xff]  }
  0x93   :  { %1173 = vmatprep.subr.bf16.mxu0 %v1672_v20  ;;  %v1753_v20 = vld [vmem:[#allocation9 + $0x324] ss:$16 sps:$4 sm:$0xff]  }
 0x115   :  { %v203_v21 = vpop.f32.mrf.mxu0 }
 0x116   :  { %v210_v24 = vpack.c.bf16 %v203_v21, %v203_v21  ;;  %v1756_v21 = vld [vmem:[#allocation9 + $0x32c] ss:$16 sps:$4 sm:$0xff]  }
 0x117   :  { %v1530_v27 = vpop.f32.mrf.mxu0 }
 0x118   :  { %651 = vmatmul.mubr.bf16.vlgmr.msra.gmra.mxu1 %v210_v24  ;;  %692 = vmatmul.mubr.bf16.vlgmr.msra.gmra.mxu0 %v210_v24  ;;  %v1754_v24 = vld [vmem:[#allocation9 + $0x328] ss:$16 sps:$4 sm:$0xff]   ;;  %v1757_v27 = vld [vmem:[#allocation9 + $0x300] ss:$16 sps:$4 sm:$0xff]  }
 0x119   :  { %v206_v28 = vpop.f32.mrf.mxu0  ;;  %1133 = vmatpush1.bf16.msra.mxu1 %v1667_v22  ;;  %1174 = vmatpush1.bf16.msra.mxu0 %v1670_v23  ;;  %v723_v22 = vpack.c.bf16 %v2057_v19, %v2057_v19  ;;  %v1751_v23 = vld [vmem:[#allocation9 + $0x320] ss:$16 sps:$4 sm:$0xff]  }
 0x11a   :  { %1134 = vmatprep.subr.bf16.mxu1 %v1675_v25  ;;  %1175 = vmatprep.subr.bf16.mxu0 %v1678_v26  ;;  %v1759_v25 = vld [vmem:[#allocation9 + $0x304] ss:$16 sps:$4 sm:$0xff]   ;;  %v1762_v26 = vld [vmem:[#allocation9 + $0x30c] ss:$16 sps:$4 sm:$0xff]   ;;  %v1760_v28 = vld [vmem:[#allocation9 + $0x308] ss:$16 sps:$4 sm:$0xff]  }
 0x11b   :  { %v1531_v31 = vpop.f32.mrf.mxu0  ;;  %1164 = vmatprep.mubr.bf16.mxu1 %v723_v22  ;;  %1205 = vmatprep.mubr.bf16.mxu0 %v723_v22 }
 0x11d   :  { %1135 = vmatpush1.bf16.msra.mxu1 %v1673_v29  ;;  %1176 = vmatpush1.bf16.msra.mxu0 %v1676_v30  ;;  %v280_v29 = vsub.s32 0, %v2045_v2  ;;  %v276_v30 = vld [vmem:[#allocation10] sm:$0xf] }
 0x11e   :  { %1136 = vmatprep.subr.bf16.mxu1 %v1681_v32  ;;  %1177 = vmatprep.subr.bf16.mxu0 %v1684_v33  ;;  %v284_v32 = vsub.s32 1, %v2045_v2 }
 0x11f   :  { %v281_v31 = vrot.slane %v276_v30, %v280_v29 }
 0x121   :  { %1137 = vmatpush1.bf16.msra.mxu1 %v1679_v34  ;;  %1178 = vmatpush1.bf16.msra.mxu0 %v1682_v35 }
 0x122   :  { %1138 = vmatprep.subr.bf16.mxu1 %v1687_v36  ;;  %1179 = vmatprep.subr.bf16.mxu0 %v1690_v37 }
 0x125   :  { %1139 = vmatpush1.bf16.msra.mxu1 %v1685_v38  ;;  %1180 = vmatpush1.bf16.msra.mxu0 %v1688_v39  ;;  %v285_v39 = vrot.slane %v276_v30, %v284_v32 }
 0x126   :  { %1140 = vmatprep.subr.bf16.mxu1 %v1693_v40  ;;  %1181 = vmatprep.subr.bf16.mxu0 %v1696_v41 }
 0x129   :  { %1141 = vmatpush1.bf16.msra.mxu1 %v1691_v42  ;;  %1182 = vmatpush1.bf16.msra.mxu0 %v1694_v43 }
 0x12a   :  { %1142 = vmatprep.subr.bf16.mxu1 %v1699_v44  ;;  %1183 = vmatprep.subr.bf16.mxu0 %v1702_v45 }
 0x12d   :  { %1143 = vmatpush1.bf16.msra.mxu1 %v1697_v46  ;;  %1184 = vmatpush1.bf16.msra.mxu0 %v1700_v47 }
 0x12e   :  { %1144 = vmatprep.subr.bf16.mxu1 %v1705_v48  ;;  %1185 = vmatprep.subr.bf16.mxu0 %v1708_v49  ;;  %v292_v48 = vsub.s32 3, %v2045_v2  ;;  %v288_v49 = vsub.s32 2, %v2045_v2 }
 0x131   :  { %1145 = vmatpush1.bf16.msra.mxu1 %v1703_v50  ;;  %1186 = vmatpush1.bf16.msra.mxu0 %v1706_v51  ;;  %v293_v51 = vrot.slane %v276_v30, %v292_v48 }
 0x132   :  { %1146 = vmatprep.subr.bf16.mxu1 %v1711_v52  ;;  %1187 = vmatprep.subr.bf16.mxu0 %v1714_v53  ;;  %v289_v52 = vrot.slane %v276_v30, %v288_v49 }
 0x135   :  { %1147 = vmatpush1.bf16.msra.mxu1 %v1709_v54  ;;  %1188 = vmatpush1.bf16.msra.mxu0 %v1712_v55 }
 0x136   :  { %1148 = vmatprep.subr.bf16.mxu1 %v1717_v56  ;;  %1189 = vmatprep.subr.bf16.mxu0 %v1720_v57 }
 0x139   :  { %1149 = vmatpush2.bf16.msra.mxu1 %v1715_v58  ;;  %1190 = vmatpush2.bf16.msra.mxu0 %v1718_v59 }
 0x13a   :  { %1150 = vmatprep.subr.bf16.mxu1 %v1723_v60  ;;  %1191 = vmatprep.subr.bf16.mxu0 %v1726_v61 }
 0x13d   :  { %1151 = vmatpush2.bf16.msra.mxu1 %v1721_v62  ;;  %1192 = vmatpush2.bf16.msra.mxu0 %v1724_v63 }
 0x13e   :  { %1152 = vmatprep.subr.bf16.mxu1 %v1729_v0  ;;  %1193 = vmatprep.subr.bf16.mxu0 %v1732_v3 }
 0x141   :  { %1153 = vmatpush2.bf16.msra.mxu1 %v1727_v4  ;;  %1194 = vmatpush2.bf16.msra.mxu0 %v1730_v5  ;;  %v1763_v4 = vld [vmem:[#allocation12 + $0x38] sm:$0xff]   ;;  %v1764_v5 = vld [vmem:[#allocation12 + $0x30] sm:$0xff]  }
 0x142   :  { %1154 = vmatprep.subr.bf16.mxu1 %v1735_v6  ;;  %1195 = vmatprep.subr.bf16.mxu0 %v1738_v7  ;;  %v1765_v6 = vld [vmem:[#allocation12 + $0x28] sm:$0xff]   ;;  %v1767_v7 = vld [vmem:[#allocation12 + $0x18] sm:$0xff]  }
 0x145   :  { %1155 = vmatpush2.bf16.msra.mxu1 %v1733_v8  ;;  %1196 = vmatpush2.bf16.msra.mxu0 %v1736_v9  ;;  %v1768_v8 = vld [vmem:[#allocation12 + $0x10] sm:$0xff]   ;;  %v1769_v9 = vld [vmem:[#allocation12 + $0x8] sm:$0xff]  }
 0x146   :  { %1156 = vmatprep.subr.bf16.mxu1 %v1741_v10  ;;  %1197 = vmatprep.subr.bf16.mxu0 %v1744_v13  ;;  %v1770_v10 = vld [vmem:[#allocation12] sm:$0xff]  }
 0x149   :  { %1157 = vmatpush2.bf16.msra.mxu1 %v1739_v11  ;;  %1198 = vmatpush2.bf16.msra.mxu0 %v1742_v12  ;;  %v790_v11 = vld [vmem:[#allocation10 + $0x4] sm:$0xf] }
 0x14a   :  { %1158 = vmatprep.subr.bf16.mxu1 %v1747_v14  ;;  %1199 = vmatprep.subr.bf16.mxu0 %v1750_v15  ;;  %v795_v12 = vrot.slane %v790_v11, %v280_v29  ;;  %v807_v30 = vrot.slane %v790_v11, %v292_v48 }
 0x14d   :  { %1159 = vmatpush2.bf16.msra.mxu1 %v1745_v16  ;;  %1200 = vmatpush2.bf16.msra.mxu0 %v1748_v18 }
 0x14e   :  { %1160 = vmatprep.subr.bf16.mxu1 %v1753_v20  ;;  %1201 = vmatprep.subr.bf16.mxu0 %v1756_v21  ;;  %v799_v21 = vrot.slane %v790_v11, %v284_v32 }
 0x151   :  { %1161 = vmatpush2.bf16.msra.mxu1 %v1751_v23  ;;  %1202 = vmatpush2.bf16.msra.mxu0 %v1754_v24 }
 0x152   :  { %1162 = vmatprep.subr.bf16.mxu1 %v1759_v25  ;;  %1203 = vmatprep.subr.bf16.mxu0 %v1762_v26 }
 0x155   :  { %1163 = vmatpush2.bf16.msra.mxu1 %v1757_v27  ;;  %1204 = vmatpush2.bf16.msra.mxu0 %v1760_v28 }
 0x156   :  { %1532 = vmatprep.subr.bf16.mxu1 %v1963_v1 }
 0x1d8   :  { %v652_v33 = vpop.f32.mrf.mxu1  ;;  %v693_v34 = vpop.f32.mrf.mxu0 }
 0x1d9   :  { %v653_v35 = vadd.f32 %v652_v33, %v281_v31  ;;  %v694_v56 = vadd.f32 %v693_v34, %v289_v52  ;;  %v803_v31 = vrot.slane %v790_v11, %v288_v49 }
 0x1da   :  { %v654_v36 = vpop.f32.mrf.mxu1  ;;  %v695_v37 = vpop.f32.mrf.mxu0 }
 0x1db   :  { %v1432_v38 = vmul.f32 -1.442695, %v653_v35  ;;  %v655_v44 = vadd.f32 %v654_v36, %v285_v39  ;;  %v696_v54 = vadd.f32 %v695_v37, %v293_v51 }
 0x1dc   :  { %v656_v40 = vpop.f32.mrf.mxu1  ;;  %v697_v41 = vpop.f32.mrf.mxu0 }
 0x1dd   :  { %1771 = vpow2.f32 %v1432_v38  ;;  %v1433_v45 = vmul.f32 -1.442695, %v655_v44 }
 0x1de   :  { %v657_v42 = vpop.f32.mrf.mxu1  ;;  %v698_v43 = vpop.f32.mrf.mxu0 }
 0x1df   :  { %1773 = vpow2.f32 %v1433_v45 }
 0x1ea   :  { %v1772_v46 = vpop.eup %1771 }
 0x1eb   :  { %v703_v47 = vadd.f32 1.0, %v1772_v46 }
 0x1ec   :  { %v1774_v50 = vpop.eup %1773 }
 0x1ed   :  { %1775 = vrcp.f32 %v703_v47  ;;  %v709_v53 = vadd.f32 1.0, %v1774_v50 }
 0x1ef   :  { %1777 = vrcp.f32 %v709_v53 }
 0x1fa   :  { %v1776_v55 = vpop.eup %1775 }
 0x1fb   :  { %v712_v57 = vmul.f32 %v1776_v55, %v696_v54 }
 0x1fc   :  { %v1778_v59 = vpop.eup %1777 }
 0x1fd   :  { %v713_v58 = vadd.f32 %v712_v57, %v694_v56  ;;  %v715_v60 = vsub.f32 1.0, %v1778_v59  ;;  %v717_v63 = vmul.f32 %v1778_v59, %v2053_v17  ;;  %v1766_v17 = vld [vmem:[#allocation12 + $0x20] sm:$0xff]  }
 0x1ff   :  { %1779 = vtanh.f32 %v713_v58 }
 0x20c   :  { %v1780_v61 = vpop.eup %1779 }
 0x20d   :  { %v716_v62 = vmul.f32 %v1780_v61, %v715_v60 }
 0x20f   :  { %v718_v0 = vadd.f32 %v717_v63, %v716_v62 }
 0x211   :  { %v722_v3 = vpack.c.bf16 %v718_v0, %v718_v0  ;;  %719 = vst [vmem:[#allocation14] sm:$0x3] %v718_v0 }
 0x213   :  { %1165 = vmatmul.mubr.bf16.vlgmr.msra.gmra.mxu1 %v722_v3  ;;  %1206 = vmatmul.mubr.bf16.vlgmr.msra.gmra.mxu0 %v722_v3 }
 0x214   :  { %1548 = vmatprep.mubr.msk.bf16.mxu1 %vm1964_vm0, %v1963_v1  ;;  %1533 = vmatpush3.bf16.msra.mxu1 %v1763_v4 }
 0x215   :  { %1534 = vmatprep.subr.bf16.mxu1 %v1963_v1 }
 0x218   :  { %1535 = vmatpush3.bf16.msra.mxu1 %v1764_v5 }
 0x219   :  { %1536 = vmatprep.subr.bf16.mxu1 %v1963_v1 }
 0x21c   :  { %1537 = vmatpush3.bf16.msra.mxu1 %v1765_v6 }
 0x21d   :  { %1538 = vmatprep.subr.bf16.mxu1 %v1963_v1 }
 0x220   :  { %1539 = vmatpush3.bf16.msra.mxu1 %v1766_v17 }
 0x221   :  { %1540 = vmatprep.subr.bf16.mxu1 %v1963_v1 }
 0x224   :  { %1541 = vmatpush3.bf16.msra.mxu1 %v1767_v7 }
 0x225   :  { %1542 = vmatprep.subr.bf16.mxu1 %v1963_v1 }
 0x228   :  { %1543 = vmatpush3.bf16.msra.mxu1 %v1768_v8 }
 0x229   :  { %1544 = vmatprep.subr.bf16.mxu1 %v1963_v1 }
 0x22c   :  { %1545 = vmatpush3.bf16.msra.mxu1 %v1769_v9 }
 0x22d   :  { %1546 = vmatprep.subr.bf16.mxu1 %v1963_v1 }
 0x230   :  { %1547 = vmatpush3.bf16.msra.mxu1 %v1770_v10 }
 0x2d3   :  { %v1166_v13 = vpop.f32.mrf.mxu1  ;;  %v1207_v14 = vpop.f32.mrf.mxu0 }
 0x2d4   :  { %v1167_v15 = vadd.f32 %v1166_v13, %v795_v12  ;;  %v1208_v35 = vadd.f32 %v1207_v14, %v803_v31 }
 0x2d5   :  { %v1168_v16 = vpop.f32.mrf.mxu1  ;;  %v1209_v18 = vpop.f32.mrf.mxu0 }
 0x2d6   :  { %v1498_v20 = vmul.f32 -1.442695, %v1167_v15  ;;  %v1169_v1 = vadd.f32 %v1168_v16, %v799_v21  ;;  %v1210_v32 = vadd.f32 %v1209_v18, %v807_v30 }
 0x2d7   :  { %v1170_v22 = vpop.f32.mrf.mxu1  ;;  %v1211_v23 = vpop.f32.mrf.mxu0 }
 0x2d8   :  { %1781 = vpow2.f32 %v1498_v20  ;;  %v1499_v26 = vmul.f32 -1.442695, %v1169_v1 }
 0x2d9   :  { %v1171_v24 = vpop.f32.mrf.mxu1  ;;  %v1212_v25 = vpop.f32.mrf.mxu0 }
 0x2da   :  { %1783 = vpow2.f32 %v1499_v26 }
 0x2e5   :  { %v1782_v27 = vpop.eup %1781 }
 0x2e6   :  { %v1217_v28 = vadd.f32 1.0, %v1782_v27 }
 0x2e7   :  { %v1784_v29 = vpop.eup %1783 }
 0x2e8   :  { %1785 = vrcp.f32 %v1217_v28  ;;  %v1223_v33 = vadd.f32 1.0, %v1784_v29 }
 0x2ea   :  { %1787 = vrcp.f32 %v1223_v33 }
 0x2f5   :  { %v1786_v34 = vpop.eup %1785 }
 0x2f6   :  { %v1226_v36 = vmul.f32 %v1786_v34, %v1210_v32 }
 0x2f7   :  { %v1788_v38 = vpop.eup %1787 }
 0x2f8   :  { %v1227_v37 = vadd.f32 %v1226_v36, %v1208_v35  ;;  %v1229_v39 = vsub.f32 1.0, %v1788_v38  ;;  %v1231_v42 = vmul.f32 %v1788_v38, %v2057_v19 }
 0x2fa   :  { %1789 = vtanh.f32 %v1227_v37 }
 0x307   :  { %v1790_v40 = vpop.eup %1789 }
 0x308   :  { %v1230_v41 = vmul.f32 %v1790_v40, %v1229_v39 }
 0x30a   :  { %v1232_v43 = vadd.f32 %v1231_v42, %v1230_v41 }
 0x30c   :  { %v1234_v44 = vpack.c.bf16 %v1232_v43, %v1232_v43  ;;  %1233 = vst [vmem:[#allocation14 + $0x2] sm:$0x3] %v1232_v43 }
 0x30e   :  { %1549 = vmatmul.mubr.bf16.vlgmr.msra.gmra.mxu1 %v1234_v44 }
 0x30f   :  { %1910 = shalt.err (!%p1907_p1)
}
 0x310   :  { %1351 = dma.vmem_to_hbm [thread:$0]  %s1346_s15, 64, %s2113_s8, [#allocation15], %s1953_s11, %s1953_s11, %s1954_s0  }
 0x311   :  { %v1500_v2 = vld [vmem:[%s2111_s6] ss:$0 sm:$0xff]  ;;  %s1966_s21 = smov [#allocation13]  }
 0x312   :  { %s1336_s22 = sshll.u32 %s1966_s21, 4  ;;  %s1337_s22 = int_to_ptr.vmem [resolvable:$true] %s1336_s22 }
 0x313   :  { %s1919_s2 = scalar_lea.vmem %s1337_s22, 32  ;;  %p1924_p3 = scmp.lt.s32.totalorder %s1337_s22, %s1337_s22 }
 0x314   :  { %p1920_p2 = scmp.ne.s32.totalorder %s1337_s22, %s1919_s2  ;;  %p1925_p4 = scmp.lt.s32.totalorder %s1919_s2, %s1919_s2 }
 0x316   :  { %p1926_p5 = por %p1925_p4, %p1924_p3 }
 0x318   :  { %p1927_p6 = pnand %p1926_p5, %p1920_p2 }
 0x3ce   :  { %v1323_v19 = vpop.f32.mrf.mxu1 }
 0x3cf   :  { %v1324_v45 = vadd.f32 %v1500_v2, %v1323_v19 }
 0x3d0   :  { %v1550_v46 = vpop.f32.mrf.mxu1 }
 0x3d1   :  { %1329 = vst [vmem:[#allocation13] sm:$0x3] %v1324_v45 }
 0x3d2   :  { %v1326_v47 = vpop.f32.mrf.mxu1 }
 0x3d3   :  { %1930 = shalt.err (!%p1927_p6)
}
 0x3d4   :  { %1339 = dma.vmem_to_hbm [thread:$0]  %s1337_s22, 32, %s2112_s7, [#allocation6]   ;;  %v1551_v48 = vpop.f32.mrf.mxu1 }
 0x3d5   :  { %1947 = dma.done.wait [#allocation6], 32  }
 0x3d6   :  { %1948 = vsyncadd [#allocation6], 4294967264 }
 0x3d7   :  { %1949 = dma.done.wait [#allocation15], 64  }
 0x3d8   :  { %1950 = vsyncadd [#allocation15], 4294967232 }
 0x3d9   :  { %1358 = vsyncpa [#allocation5], 1 }
 0x3da   :  { %1359 = vsyncpa [#allocation8], 1 }
 0x3db   :  { %1360 = vsyncpa [#allocation11], 1 }
 0x3dc   :  { %1361 = vsyncpa [#allocation6], 1 }
 0x3dd   :  { %1362 = vsyncpa [#allocation15], 1 }

</bundles_post_ra>
